<compile_context>
chip_gen: v7x
topology: tpu7x:2x2x1
jax: 0.10.0
libtpu: 0.0.40
codegen_flags: <defaults>
</compile_context>

<pallas_src>
import functools

import jax
import jax.numpy as jnp
from jax.experimental import pallas as pl
from jax.experimental.pallas import tpu as pltpu


def _softplus_kernel(x_ref, o_ref):
    # log1p(exp(x)) == log(1 + exp(x))  (the PyTorch module's formula).
    x = x_ref[...].astype(jnp.float32)
    o_ref[...] = jnp.log1p(jnp.exp(x)).astype(o_ref.dtype)


def _round_up(a: int, b: int) -> int:
    return ((a + b - 1) // b) * b


@functools.partial(jax.jit, static_argnames=("tile_rows", "lane"))
def softplus(x: jax.Array, *, tile_rows: int = 1024, lane: int = 512) -> jax.Array:
    """Elementwise log(1 + exp(x)) on arbitrary-shaped input."""
    orig_shape = x.shape
    orig_dtype = x.dtype
    n = x.size

    # Lane-dense 2D slab [rows, lane].  Pad only up to a multiple of `lane`
    # (at most lane-1 elements) — never a full tile_rows*lane block.
    x_flat = jnp.ravel(x)
    n_pad = _round_up(n, lane)
    if n_pad != n:
        x_flat = jnp.pad(x_flat, (0, n_pad - n))
    rows = n_pad // lane
    x2d = x_flat.reshape(rows, lane)

    # Block sizing: target ~2 MiB f32 tiles (1024 x 512), clamped to the actual
    # row count (rounded to the 8-sublane granule).  With enough rows, cap the
    # block so the grid has >= 2 steps (dual-TC v7x; negligible cost elsewhere).
    block_rows = min(tile_rows, _round_up(rows, 8))
    if rows >= 16:
        block_rows = min(block_rows, _round_up(pl.cdiv(rows, 2), 8))
    grid = (pl.cdiv(rows, block_rows),)

    out2d = pl.pallas_call(
        _softplus_kernel,
        out_shape=jax.ShapeDtypeStruct((rows, lane), orig_dtype),
        grid_spec=pltpu.PrefetchScalarGridSpec(
            num_scalar_prefetch=0,
            grid=grid,
            in_specs=[pl.BlockSpec((block_rows, lane), lambda i: (i, 0))],
            out_specs=pl.BlockSpec((block_rows, lane), lambda i: (i, 0)),
        ),
        compiler_params=pltpu.CompilerParams(
            dimension_semantics=("parallel",),
            # in + out, double-buffered ≈ 4x tile bytes (~8 MiB at 2 MiB tiles);
            # explicit headroom so pipelining never silently shrinks.
            vmem_limit_bytes=32 * 1024 * 1024,
        ),
    )(x2d)

    out_flat = out2d.reshape(-1)
    if n_pad != n:
        out_flat = out_flat[:n]
    return out_flat.reshape(orig_shape)


if __name__ == "__main__":
    key = jax.random.PRNGKey(0)
    # NCHW input, small shape consistent with a conv-style activation.
    x = jax.random.normal(key, (2, 4, 16, 16), dtype=jnp.float32)

    y = softplus(x)
    jax.block_until_ready(y)

    # Reference check against the PyTorch module's formula: log(1 + exp(x)).
    y_ref = jnp.log(1.0 + jnp.exp(x))
    assert y.shape == x.shape and y.dtype == x.dtype
    assert jnp.allclose(y, y_ref, atol=1e-5, rtol=1e-5)

    print("KERNEL_OK")
</pallas_src>

<mosaic_0001>
module attributes {stable_mosaic.version = 11 : i64} {
  func.func @_softplus_kernel(%arg0: i32, %arg1: memref<8x512xf32, #tpu.memory_space<vmem>>, %arg2: memref<8x512xf32, #tpu.memory_space<vmem>>) attributes {dimension_semantics = [#tpu.dimension_semantics<parallel>], iteration_bounds = array<i64: 1>, scalar_prefetch = 0 : i64, scratch_operands = 0 : i64, tpu.core_type = #tpu.core_type<tc>, window_params = [{transform_indices = @transform_0, window_bounds = array<i64: 8, 512>}, {transform_indices = @transform_1, window_bounds = array<i64: 8, 512>}]} {
    %c0 = arith.constant 0 : index
    %c0_0 = arith.constant 0 : index
    %0 = vector.load %arg1[%c0, %c0_0] : memref<8x512xf32, #tpu.memory_space<vmem>>, vector<8x512xf32>
    %1 = math.exp %0 : vector<8x512xf32>
    %2 = math.log1p %1 : vector<8x512xf32>
    %c0_1 = arith.constant 0 : index
    %c0_2 = arith.constant 0 : index
    %3 = vector.load %arg2[%c0_1, %c0_2] : memref<8x512xf32, #tpu.memory_space<vmem>>, vector<8x512xf32>
    tpu.vector_store %arg2[%c0_1, %c0_2], %2 {strides = array<i32>} : memref<8x512xf32, #tpu.memory_space<vmem>>, vector<8x512xf32>,
    return
  }
  func.func @transform_0(%arg0: i32) -> (i32, i32) {
    %c0_i32 = arith.constant 0 : i32
    %c0_i32_0 = arith.constant 0 : i32
    return %arg0, %c0_i32 : i32, i32
  }
  func.func @transform_1(%arg0: i32) -> (i32, i32) {
    %c0_i32 = arith.constant 0 : i32
    %c0_i32_0 = arith.constant 0 : i32
    return %arg0, %c0_i32 : i32, i32
  }
}

</mosaic_0001>

<bundles_post_ra>
// kernel: softplus.1
= control target key start
LH: loop header
LB: loop body
LE: loop exit
PB: predicated region body
PF: predicated region fallthrough
CT: control target
= control target key end

     0   :  { %s117_s0 = inlined_call_operand.vmem [shape: f32[4,512], index: 0, kind: input, shape index: {}]   ;;  %s118_s1 = inlined_call_operand.vmem [shape: f32[4,512], index: 1, kind: output, shape index: {}]  }
   0x1   :  { %v8_v0 = vld [vmem:[%s117_s0] sm:$0xff]  ;;  %v9_v1 = vld [vmem:[%s117_s0 + $0x8] sm:$0xff] }
   0x2   :  { %v12_v2 = vmul.f32 1.442695, %v8_v0  ;;  %v14_v3 = vmul.f32 1.442695, %v9_v1 }
   0x4   :  { %87 = vpow2.f32 %v12_v2 }
   0x5   :  { %89 = vpow2.f32 %v14_v3 }
   0xe   :  { %v88_v4 = vpop.eup %87 }
   0xf   :  { %v90_v5 = vpop.eup %89  ;;  %v20_v6 = vadd.f32 1.0, %v88_v4  ;;  %v23_v8 = vmul.f32 -0.5, %v88_v4  ;;  %v26_v11 = vand.u32 2147483647, %v88_v4 }
  0x10   :  { %v29_v7 = vadd.f32 1.0, %v90_v5  ;;  %v32_v9 = vmul.f32 -0.5, %v90_v5  ;;  %v35_v13 = vand.u32 2147483647, %v90_v5 }
  0x11   :  { %91 = vlog2.f32 %v20_v6  ;;  %v24_v10 = vadd.f32 1.0, %v23_v8  ;;  %vm27_vm0 = vcmp.lt.f32.partialorder %v26_v11, 0.0004427343 }
  0x12   :  { %93 = vlog2.f32 %v29_v7  ;;  %v33_v12 = vadd.f32 1.0, %v32_v9  ;;  %vm36_vm1 = vcmp.lt.f32.partialorder %v35_v13, 0.0004427343 }
  0x13   :  { %v25_v14 = vmul.f32 %v88_v4, %v24_v10 }
  0x14   :  { %v34_v16 = vmul.f32 %v90_v5, %v33_v12 }
  0x1b   :  { %v92_v15 = vpop.eup %91 }
  0x1c   :  { %v94_v17 = vpop.eup %93  ;;  %v22_v18 = vmul.f32 0.6931472, %v92_v15 }
  0x1d   :  { %v31_v19 = vmul.f32 0.6931472, %v94_v17 }
  0x1e   :  { %v28_v20 = vsel %vm27_vm0, %v25_v14, %v22_v18 }
  0x1f   :  { %75 = vst [vmem:[%s118_s1] sm:$0xff] %v28_v20  ;;  %v37_v21 = vsel %vm36_vm1, %v34_v16, %v31_v19 }
  0x20   :  { %77 = vst [vmem:[%s118_s1 + $0x8] sm:$0xff] %v37_v21 }

</bundles_post_ra>
